<compile_context>
chip_gen: v5e
topology: v5e:2x2
jax: 0.10.0
libtpu: 0.0.40
codegen_flags: <defaults>
</compile_context>

<pallas_src>
import math
import jax
import jax.numpy as jnp
import numpy as np
from jax.experimental import pallas as pl
from jax.experimental.pallas import tpu as pltpu

INV_SQRT2 = 1.0 / math.sqrt(2.0)

# ----------------------------------------------------------------------------
# Parameter bookkeeping (original / unfused parameterization, mirrors torch)
# ----------------------------------------------------------------------------
PARAM_NAMES = (
    ["Wd", "bd"]
    + [f"{pre}{kind}{l}" for pre in ("t_", "f_") for l in (1, 2, 3, 4) for kind in ("W", "b")]
    + ["Wm", "bm", "Wo", "bo"]   # mid_projection / output_projection ((C, 2C))
)


def init_params(key, cond_dim, diffusion_embedding_dim):
    """Deterministic synthetic parameters (shapes match the torch module)."""
    C, E = cond_dim, diffusion_embedding_dim
    mlp_dims = [(C, 256), (256, 128), (128, 128), (128, C)]

    shapes, fan_in = {}, {}
    shapes["Wd"], fan_in["Wd"] = (E, C), E
    shapes["bd"], fan_in["bd"] = (1, C), E
    for pre in ("t_", "f_"):
        for l, (din, dout) in enumerate(mlp_dims, start=1):
            shapes[f"{pre}W{l}"], fan_in[f"{pre}W{l}"] = (din, dout), din
            shapes[f"{pre}b{l}"], fan_in[f"{pre}b{l}"] = (1, dout), din
    # mid/output projections: Linear(C, 2C); the chunk happens on the activation
    # dim, so the fused (C, 2C) weight IS the torch layout (transposed).
    shapes["Wm"], fan_in["Wm"] = (C, 2 * C), C
    shapes["bm"], fan_in["bm"] = (1, 2 * C), C
    shapes["Wo"], fan_in["Wo"] = (C, 2 * C), C
    shapes["bo"], fan_in["bo"] = (1, 2 * C), C

    params = {}
    keys = jax.random.split(key, len(PARAM_NAMES))
    for k, name in zip(keys, PARAM_NAMES):
        scale = 1.0 / math.sqrt(max(fan_in[name], 1))
        params[name] = jax.random.uniform(k, shapes[name], jnp.float32, -1.0, 1.0) * scale
    return params


# ----------------------------------------------------------------------------
# Algebraic weight folding (done once, outside the kernel, in f32)
# ----------------------------------------------------------------------------
def prepare_fused_params(params, weight_dtype=jnp.bfloat16):
    p = params
    C = p["Wm"].shape[0]

    # (1) diffusion_projection + add folded into time fc1, with x/demb stacked
    #     along features:  relu([x|demb] @ [tW1; Wd@tW1] + (bd@tW1 + tb1)).
    w1 = jnp.concatenate([p["t_W1"], p["Wd"] @ p["t_W1"]], axis=0)   # (C+E, 256)
    b1 = p["bd"] @ p["t_W1"] + p["t_b1"]                             # (1, 256)

    # (2) time fc4 (linear, no ReLU after it) folded into feature fc1.
    w_tf = p["t_W4"] @ p["f_W1"]                                     # (128, 256)
    b_tf = p["t_b4"] @ p["f_W1"] + p["f_b1"]                         # (1, 256)

    # (3) feature fc4 (linear) folded into mid_projection.
    w_fm = p["f_W4"] @ p["Wm"]                                       # (128, 2C)
    b_fm = p["f_b4"] @ p["Wm"] + p["bm"]                             # (1, 2C)

    # (4) 1/sqrt(2) folded into the residual half of output_projection.
    scale = jnp.concatenate(
        [jnp.full((1, C), INV_SQRT2, jnp.float32), jnp.ones((1, C), jnp.float32)], axis=1)
    wo = p["Wo"] * scale                                             # (C, 2C)
    bo = p["bo"] * scale                                             # (1, 2C)

    def w(a):  # matmul weights narrowed for the MXU; biases stay f32
        return a.astype(weight_dtype)

    return [
        w(w1), b1,
        w(p["t_W2"]), p["t_b2"], w(p["t_W3"]), p["t_b3"],
        w(w_tf), b_tf,
        w(p["f_W2"]), p["f_b2"], w(p["f_W3"]), p["f_b3"],
        w(w_fm), b_fm,
        w(wo), bo,
    ]


# ----------------------------------------------------------------------------
# Pallas kernel
# ----------------------------------------------------------------------------
def _make_kernel(compute_dtype, cond_dim):
    C = cond_dim

    def kernel(xe_ref,
               w1, b1, tw2, tb2, tw3, tb3,
               w_tf, b_tf, fw2, fb2, fw3, fb3,
               w_fm, b_fm, wo, bo,
               out_ref):
        xe = xe_ref[...]                                   # (TB, C+E), f32

        def dot(a, w_ref):
            # Weight Refs are read at the point of use (short live ranges);
            # the MXU accumulates in f32 regardless of the compute dtype.
            return jnp.dot(a, w_ref[...], preferred_element_type=jnp.float32)

        def act(pre):
            # bias-add + ReLU in f32, then a single cast feeding the next dot.
            return jnp.maximum(pre, 0.0).astype(compute_dtype)

        # diffusion_projection + add + time fc1 (all folded into one dot).
        h = act(dot(xe.astype(compute_dtype), w1) + b1[...])
        h = act(dot(h, tw2) + tb2[...])
        h = act(dot(h, tw3) + tb3[...])
        # time fc4 folded into feature fc1.
        h = act(dot(h, w_tf) + b_tf[...])
        h = act(dot(h, fw2) + fb2[...])
        h = act(dot(h, fw3) + fb3[...])

        # feature fc4 folded into mid_projection: [gate | filter] in one dot.
        # (For C < 128 a split into two (128, C) dots may be neutral-to-better;
        #  kept fused here for a single MXU issue.)
        z = dot(h, w_fm) + b_fm[...]                       # (TB, 2C), f32
        g = jax.nn.sigmoid(z[:, :C]) * jnp.tanh(z[:, C:])  # f32 epilogue

        # output projection: [residual*inv_sqrt2 | skip] in one dot
        # (1/sqrt2 pre-folded into the residual half of wo/bo).
        o = dot(g.astype(compute_dtype), wo) + bo[...]     # (TB, 2C), f32

        # Two direct static-slice stores (no concatenate temp at the
        # non-128-aligned C boundary).
        out_ref[:, :C] = xe[:, :C] * INV_SQRT2 + o[:, :C]
        out_ref[:, C:] = o[:, C:]

    return kernel


# ----------------------------------------------------------------------------
# Wrapper
# ----------------------------------------------------------------------------
def residual_block_forward(x, cond_info, diffusion_emb, params, *,
                           block_b=None, compute_dtype=jnp.bfloat16):
    """Pallas implementation of ResidualBlock.forward.

    cond_info is accepted for API parity but is unused by the torch forward().
    compute_dtype=jnp.bfloat16 (default) runs the matmul chain at the native
    MXU rate; the bias/activation/residual epilogue stays f32.
    """
    del cond_info  # unused by the reference forward pass
    B, C = x.shape
    E = diffusion_emb.shape[1]

    # One-time XLA concat so the kernel does a single K=C+E dot for
    # x @ tW1 + (demb @ Wd) @ tW1.
    xe = jnp.concatenate([x.astype(jnp.float32), diffusion_emb.astype(jnp.float32)], axis=1)

    if block_b is None:
        TB = B
        if B > 2048:
            # Large batch: tile it.  Prefer an even number of grid steps
            # (balanced across v7x's two TensorCores), else the largest tile.
            chosen = None
            for even_only in (True, False):
                for cand in (2048, 1024, 512, 256):
                    if B % cand == 0 and (not even_only or (B // cand) % 2 == 0):
                        chosen = cand
                        break
                if chosen is not None:
                    break
            if chosen is not None:
                TB = chosen
    else:
        TB = block_b
    assert B % TB == 0, "batch must be a multiple of the batch tile"

    fused = prepare_fused_params(params, weight_dtype=compute_dtype)

    def act_spec(feat):
        return pl.BlockSpec((TB, feat), lambda i: (i, 0))

    def full_spec(arr):
        # Whole (small) parameter resident every grid step; constant index_map.
        return pl.BlockSpec(arr.shape, lambda i: (0, 0))

    in_specs = [act_spec(C + E)] + [full_spec(a) for a in fused]
    out_specs = pl.BlockSpec((TB, 2 * C), lambda i: (i, 0))

    out = pl.pallas_call(
        _make_kernel(compute_dtype, C),
        out_shape=jax.ShapeDtypeStruct((B, 2 * C), jnp.float32),
        grid_spec=pltpu.PrefetchScalarGridSpec(
            num_scalar_prefetch=0,
            grid=(B // TB,),
            in_specs=in_specs,
            out_specs=out_specs,
        ),
        compiler_params=pltpu.CompilerParams(
            dimension_semantics=("parallel",),
            # Explicit, portable scoped-VMEM budget (well above actual usage,
            # well below every generation's physical VMEM including v7x 64 MiB).
            vmem_limit_bytes=32 * 1024 * 1024,
        ),
    )(xe, *fused)

    return out[:, :C], out[:, C:]


# ----------------------------------------------------------------------------
# Pure-JAX reference (mirrors the torch module exactly, unfused, f32)
# ----------------------------------------------------------------------------
def residual_block_reference(x, cond_info, diffusion_emb, params):
    del cond_info
    p = params
    C = x.shape[1]

    def linear(y, w, b):
        return y @ w + b

    def mlp(y, pre):
        for l in (1, 2, 3):
            y = jnp.maximum(linear(y, p[f"{pre}W{l}"], p[f"{pre}b{l}"]), 0.0)
        return linear(y, p[f"{pre}W4"], p[f"{pre}b4"])

    y = x + linear(diffusion_emb, p["Wd"], p["bd"])
    y = mlp(y, "t_")
    y = mlp(y, "f_")
    z = linear(y, p["Wm"], p["bm"])
    gate, filt = z[:, :C], z[:, C:]
    y = jax.nn.sigmoid(gate) * jnp.tanh(filt)
    o = linear(y, p["Wo"], p["bo"])
    residual, skip = o[:, :C], o[:, C:]
    return (x + residual) / math.sqrt(2.0), skip


# ----------------------------------------------------------------------------
# Driver
# ----------------------------------------------------------------------------
if __name__ == "__main__":
    B = 8                 # batch
    COND_DIM = 32         # cond_dim  (x is (B, cond_dim))
    DIFF_EMB_DIM = 16     # diffusion_embedding_dim
    # side_dim / nheads / output_projection_for_x are unused by forward().

    key = jax.random.PRNGKey(0)
    k_x, k_emb, k_cond, k_params = jax.random.split(key, 4)

    x = jax.random.normal(k_x, (B, COND_DIM), jnp.float32)
    diffusion_emb = jax.random.normal(k_emb, (B, DIFF_EMB_DIM), jnp.float32)
    cond_info = jax.random.normal(k_cond, (B, COND_DIM), jnp.float32)  # unused, API parity
    params = init_params(k_params, COND_DIM, DIFF_EMB_DIM)

    res_ref, skip_ref = residual_block_reference(x, cond_info, diffusion_emb, params)

    # f32 compute path: only f32-accumulation reordering from the folds.
    res32, skip32 = residual_block_forward(
        x, cond_info, diffusion_emb, params, compute_dtype=jnp.float32)
    res32 = jax.block_until_ready(res32)
    skip32 = jax.block_until_ready(skip32)
    np.testing.assert_allclose(np.asarray(res32), np.asarray(res_ref), rtol=1e-4, atol=1e-5)
    np.testing.assert_allclose(np.asarray(skip32), np.asarray(skip_ref), rtol=1e-4, atol=1e-5)

    # Default bf16 matmul path: tolerances scale with the compute dtype.
    res_bf, skip_bf = residual_block_forward(x, cond_info, diffusion_emb, params)
    res_bf = jax.block_until_ready(res_bf)
    skip_bf = jax.block_until_ready(skip_bf)
    np.testing.assert_allclose(np.asarray(res_bf), np.asarray(res_ref), rtol=5e-2, atol=5e-2)
    np.testing.assert_allclose(np.asarray(skip_bf), np.asarray(skip_ref), rtol=5e-2, atol=5e-2)

    print("KERNEL_OK")
</pallas_src>

<mosaic_0001>
module attributes {stable_mosaic.version = 11 : i64} {
  func.func @kernel(%arg0: i32, %arg1: memref<8x48xf32, #tpu.memory_space<vmem>>, %arg2: memref<48x256xf32, #tpu.memory_space<vmem>>, %arg3: memref<1x256xf32, #tpu.memory_space<vmem>>, %arg4: memref<256x128xf32, #tpu.memory_space<vmem>>, %arg5: memref<1x128xf32, #tpu.memory_space<vmem>>, %arg6: memref<128x128xf32, #tpu.memory_space<vmem>>, %arg7: memref<1x128xf32, #tpu.memory_space<vmem>>, %arg8: memref<128x256xf32, #tpu.memory_space<vmem>>, %arg9: memref<1x256xf32, #tpu.memory_space<vmem>>, %arg10: memref<256x128xf32, #tpu.memory_space<vmem>>, %arg11: memref<1x128xf32, #tpu.memory_space<vmem>>, %arg12: memref<128x128xf32, #tpu.memory_space<vmem>>, %arg13: memref<1x128xf32, #tpu.memory_space<vmem>>, %arg14: memref<128x64xf32, #tpu.memory_space<vmem>>, %arg15: memref<1x64xf32, #tpu.memory_space<vmem>>, %arg16: memref<32x64xf32, #tpu.memory_space<vmem>>, %arg17: memref<1x64xf32, #tpu.memory_space<vmem>>, %arg18: memref<8x64xf32, #tpu.memory_space<vmem>>) attributes {dimension_semantics = [#tpu.dimension_semantics<parallel>], iteration_bounds = array<i64: 1>, scalar_prefetch = 0 : i64, scratch_operands = 0 : i64, tpu.core_type = #tpu.core_type<tc>, window_params = [{transform_indices = @transform_0, window_bounds = array<i64: 8, 48>}, {pipeline_mode = #tpu.pipeline_mode<synchronous>, transform_indices = @transform_1, window_bounds = array<i64: 48, 256>}, {pipeline_mode = #tpu.pipeline_mode<synchronous>, transform_indices = @transform_2, window_bounds = array<i64: 1, 256>}, {pipeline_mode = #tpu.pipeline_mode<synchronous>, transform_indices = @transform_3, window_bounds = array<i64: 256, 128>}, {pipeline_mode = #tpu.pipeline_mode<synchronous>, transform_indices = @transform_4, window_bounds = array<i64: 1, 128>}, {pipeline_mode = #tpu.pipeline_mode<synchronous>, transform_indices = @transform_5, window_bounds = array<i64: 128, 128>}, {pipeline_mode = #tpu.pipeline_mode<synchronous>, transform_indices = @transform_6, window_bounds = array<i64: 1, 128>}, {pipeline_mode = #tpu.pipeline_mode<synchronous>, transform_indices = @transform_7, window_bounds = array<i64: 128, 256>}, {pipeline_mode = #tpu.pipeline_mode<synchronous>, transform_indices = @transform_8, window_bounds = array<i64: 1, 256>}, {pipeline_mode = #tpu.pipeline_mode<synchronous>, transform_indices = @transform_9, window_bounds = array<i64: 256, 128>}, {pipeline_mode = #tpu.pipeline_mode<synchronous>, transform_indices = @transform_10, window_bounds = array<i64: 1, 128>}, {pipeline_mode = #tpu.pipeline_mode<synchronous>, transform_indices = @transform_11, window_bounds = array<i64: 128, 128>}, {pipeline_mode = #tpu.pipeline_mode<synchronous>, transform_indices = @transform_12, window_bounds = array<i64: 1, 128>}, {pipeline_mode = #tpu.pipeline_mode<synchronous>, transform_indices = @transform_13, window_bounds = array<i64: 128, 64>}, {pipeline_mode = #tpu.pipeline_mode<synchronous>, transform_indices = @transform_14, window_bounds = array<i64: 1, 64>}, {pipeline_mode = #tpu.pipeline_mode<synchronous>, transform_indices = @transform_15, window_bounds = array<i64: 32, 64>}, {pipeline_mode = #tpu.pipeline_mode<synchronous>, transform_indices = @transform_16, window_bounds = array<i64: 1, 64>}, {transform_indices = @transform_17, window_bounds = array<i64: 8, 64>}]} {
    %c0 = arith.constant 0 : index
    %c0_0 = arith.constant 0 : index
    %0 = vector.load %arg1[%c0, %c0_0] : memref<8x48xf32, #tpu.memory_space<vmem>>, vector<8x48xf32>
    %c0_1 = arith.constant 0 : index
    %c0_2 = arith.constant 0 : index
    %1 = vector.load %arg2[%c0_1, %c0_2] : memref<48x256xf32, #tpu.memory_space<vmem>>, vector<48x256xf32>
    %cst = arith.constant dense<0.000000e+00> : vector<8x256xf32>
    %2 = tpu.matmul %0, %1, %cst {dimension_numbers = #tpu.dot_dimension_numbers<[1], [0], [0], [1], [0, 0, 1, 1], [], []>} : vector<8x48xf32>, vector<48x256xf32>, vector<8x256xf32> -> vector<8x256xf32>
    %c0_3 = arith.constant 0 : index
    %c0_4 = arith.constant 0 : index
    %3 = vector.load %arg3[%c0_3, %c0_4] : memref<1x256xf32, #tpu.memory_space<vmem>>, vector<1x256xf32>
    %4 = vector.broadcast %3 : vector<1x256xf32> to vector<8x256xf32>
    %5 = arith.addf %2, %4 : vector<8x256xf32>
    %cst_5 = arith.constant 0.000000e+00 : f32
    %6 = vector.broadcast %cst_5 : f32 to vector<8x256xf32>
    %7 = arith.maximumf %5, %6 : vector<8x256xf32>
    %c0_6 = arith.constant 0 : index
    %c0_7 = arith.constant 0 : index
    %8 = vector.load %arg4[%c0_6, %c0_7] : memref<256x128xf32, #tpu.memory_space<vmem>>, vector<256x128xf32>
    %cst_8 = arith.constant dense<0.000000e+00> : vector<8x128xf32>
    %9 = tpu.matmul %7, %8, %cst_8 {dimension_numbers = #tpu.dot_dimension_numbers<[1], [0], [0], [1], [0, 0, 1, 1], [], []>} : vector<8x256xf32>, vector<256x128xf32>, vector<8x128xf32> -> vector<8x128xf32>
    %c0_9 = arith.constant 0 : index
    %c0_10 = arith.constant 0 : index
    %10 = vector.load %arg5[%c0_9, %c0_10] : memref<1x128xf32, #tpu.memory_space<vmem>>, vector<1x128xf32>
    %11 = vector.broadcast %10 : vector<1x128xf32> to vector<8x128xf32>
    %12 = arith.addf %9, %11 : vector<8x128xf32>
    %cst_11 = arith.constant 0.000000e+00 : f32
    %13 = vector.broadcast %cst_11 : f32 to vector<8x128xf32>
    %14 = arith.maximumf %12, %13 : vector<8x128xf32>
    %c0_12 = arith.constant 0 : index
    %c0_13 = arith.constant 0 : index
    %15 = vector.load %arg6[%c0_12, %c0_13] : memref<128x128xf32, #tpu.memory_space<vmem>>, vector<128x128xf32>
    %cst_14 = arith.constant dense<0.000000e+00> : vector<8x128xf32>
    %16 = tpu.matmul %14, %15, %cst_14 {dimension_numbers = #tpu.dot_dimension_numbers<[1], [0], [0], [1], [0, 0, 1, 1], [], []>} : vector<8x128xf32>, vector<128x128xf32>, vector<8x128xf32> -> vector<8x128xf32>
    %c0_15 = arith.constant 0 : index
    %c0_16 = arith.constant 0 : index
    %17 = vector.load %arg7[%c0_15, %c0_16] : memref<1x128xf32, #tpu.memory_space<vmem>>, vector<1x128xf32>
    %18 = vector.broadcast %17 : vector<1x128xf32> to vector<8x128xf32>
    %19 = arith.addf %16, %18 : vector<8x128xf32>
    %cst_17 = arith.constant 0.000000e+00 : f32
    %20 = vector.broadcast %cst_17 : f32 to vector<8x128xf32>
    %21 = arith.maximumf %19, %20 : vector<8x128xf32>
    %c0_18 = arith.constant 0 : index
    %c0_19 = arith.constant 0 : index
    %22 = vector.load %arg8[%c0_18, %c0_19] : memref<128x256xf32, #tpu.memory_space<vmem>>, vector<128x256xf32>
    %cst_20 = arith.constant dense<0.000000e+00> : vector<8x256xf32>
    %23 = tpu.matmul %21, %22, %cst_20 {dimension_numbers = #tpu.dot_dimension_numbers<[1], [0], [0], [1], [0, 0, 1, 1], [], []>} : vector<8x128xf32>, vector<128x256xf32>, vector<8x256xf32> -> vector<8x256xf32>
    %c0_21 = arith.constant 0 : index
    %c0_22 = arith.constant 0 : index
    %24 = vector.load %arg9[%c0_21, %c0_22] : memref<1x256xf32, #tpu.memory_space<vmem>>, vector<1x256xf32>
    %25 = vector.broadcast %24 : vector<1x256xf32> to vector<8x256xf32>
    %26 = arith.addf %23, %25 : vector<8x256xf32>
    %cst_23 = arith.constant 0.000000e+00 : f32
    %27 = vector.broadcast %cst_23 : f32 to vector<8x256xf32>
    %28 = arith.maximumf %26, %27 : vector<8x256xf32>
    %c0_24 = arith.constant 0 : index
    %c0_25 = arith.constant 0 : index
    %29 = vector.load %arg10[%c0_24, %c0_25] : memref<256x128xf32, #tpu.memory_space<vmem>>, vector<256x128xf32>
    %cst_26 = arith.constant dense<0.000000e+00> : vector<8x128xf32>
    %30 = tpu.matmul %28, %29, %cst_26 {dimension_numbers = #tpu.dot_dimension_numbers<[1], [0], [0], [1], [0, 0, 1, 1], [], []>} : vector<8x256xf32>, vector<256x128xf32>, vector<8x128xf32> -> vector<8x128xf32>
    %c0_27 = arith.constant 0 : index
    %c0_28 = arith.constant 0 : index
    %31 = vector.load %arg11[%c0_27, %c0_28] : memref<1x128xf32, #tpu.memory_space<vmem>>, vector<1x128xf32>
    %32 = vector.broadcast %31 : vector<1x128xf32> to vector<8x128xf32>
    %33 = arith.addf %30, %32 : vector<8x128xf32>
    %cst_29 = arith.constant 0.000000e+00 : f32
    %34 = vector.broadcast %cst_29 : f32 to vector<8x128xf32>
    %35 = arith.maximumf %33, %34 : vector<8x128xf32>
    %c0_30 = arith.constant 0 : index
    %c0_31 = arith.constant 0 : index
    %36 = vector.load %arg12[%c0_30, %c0_31] : memref<128x128xf32, #tpu.memory_space<vmem>>, vector<128x128xf32>
    %cst_32 = arith.constant dense<0.000000e+00> : vector<8x128xf32>
    %37 = tpu.matmul %35, %36, %cst_32 {dimension_numbers = #tpu.dot_dimension_numbers<[1], [0], [0], [1], [0, 0, 1, 1], [], []>} : vector<8x128xf32>, vector<128x128xf32>, vector<8x128xf32> -> vector<8x128xf32>
    %c0_33 = arith.constant 0 : index
    %c0_34 = arith.constant 0 : index
    %38 = vector.load %arg13[%c0_33, %c0_34] : memref<1x128xf32, #tpu.memory_space<vmem>>, vector<1x128xf32>
    %39 = vector.broadcast %38 : vector<1x128xf32> to vector<8x128xf32>
    %40 = arith.addf %37, %39 : vector<8x128xf32>
    %cst_35 = arith.constant 0.000000e+00 : f32
    %41 = vector.broadcast %cst_35 : f32 to vector<8x128xf32>
    %42 = arith.maximumf %40, %41 : vector<8x128xf32>
    %c0_36 = arith.constant 0 : index
    %c0_37 = arith.constant 0 : index
    %43 = vector.load %arg14[%c0_36, %c0_37] : memref<128x64xf32, #tpu.memory_space<vmem>>, vector<128x64xf32>
    %cst_38 = arith.constant dense<0.000000e+00> : vector<8x64xf32>
    %44 = tpu.matmul %42, %43, %cst_38 {dimension_numbers = #tpu.dot_dimension_numbers<[1], [0], [0], [1], [0, 0, 1, 1], [], []>} : vector<8x128xf32>, vector<128x64xf32>, vector<8x64xf32> -> vector<8x64xf32>
    %c0_39 = arith.constant 0 : index
    %c0_40 = arith.constant 0 : index
    %45 = vector.load %arg15[%c0_39, %c0_40] : memref<1x64xf32, #tpu.memory_space<vmem>>, vector<1x64xf32>
    %46 = vector.broadcast %45 : vector<1x64xf32> to vector<8x64xf32>
    %47 = arith.addf %44, %46 : vector<8x64xf32>
    %48 = vector.extract_strided_slice %47 {offsets = [0, 0], sizes = [8, 32], strides = [1, 1]} : vector<8x64xf32> to vector<8x32xf32>
    %49 = arith.negf %48 : vector<8x32xf32>
    %50 = math.exp %49 : vector<8x32xf32>
    %cst_41 = arith.constant 1.000000e+00 : f32
    %51 = vector.broadcast %cst_41 : f32 to vector<8x32xf32>
    %52 = arith.addf %51, %50 : vector<8x32xf32>
    %53 = arith.divf %51, %52 : vector<8x32xf32>
    %54 = vector.extract_strided_slice %47 {offsets = [0, 32], sizes = [8, 32], strides = [1, 1]} : vector<8x64xf32> to vector<8x32xf32>
    %55 = math.tanh %54 : vector<8x32xf32>
    %56 = arith.mulf %53, %55 : vector<8x32xf32>
    %c0_42 = arith.constant 0 : index
    %c0_43 = arith.constant 0 : index
    %57 = vector.load %arg16[%c0_42, %c0_43] : memref<32x64xf32, #tpu.memory_space<vmem>>, vector<32x64xf32>
    %cst_44 = arith.constant dense<0.000000e+00> : vector<8x64xf32>
    %58 = tpu.matmul %56, %57, %cst_44 {dimension_numbers = #tpu.dot_dimension_numbers<[1], [0], [0], [1], [0, 0, 1, 1], [], []>} : vector<8x32xf32>, vector<32x64xf32>, vector<8x64xf32> -> vector<8x64xf32>
    %c0_45 = arith.constant 0 : index
    %c0_46 = arith.constant 0 : index
    %59 = vector.load %arg17[%c0_45, %c0_46] : memref<1x64xf32, #tpu.memory_space<vmem>>, vector<1x64xf32>
    %60 = vector.broadcast %59 : vector<1x64xf32> to vector<8x64xf32>
    %61 = arith.addf %58, %60 : vector<8x64xf32>
    %62 = vector.extract_strided_slice %0 {offsets = [0, 0], sizes = [8, 32], strides = [1, 1]} : vector<8x48xf32> to vector<8x32xf32>
    %cst_47 = arith.constant 0.707106769 : f32
    %63 = vector.broadcast %cst_47 : f32 to vector<8x32xf32>
    %64 = arith.mulf %62, %63 : vector<8x32xf32>
    %65 = vector.extract_strided_slice %61 {offsets = [0, 0], sizes = [8, 32], strides = [1, 1]} : vector<8x64xf32> to vector<8x32xf32>
    %66 = arith.addf %64, %65 : vector<8x32xf32>
    %c0_48 = arith.constant 0 : index
    %c0_49 = arith.constant 0 : index
    %67 = vector.load %arg18[%c0_48, %c0_49] : memref<8x64xf32, #tpu.memory_space<vmem>>, vector<8x32xf32>
    tpu.vector_store %arg18[%c0_48, %c0_49], %66 {strides = array<i32>} : memref<8x64xf32, #tpu.memory_space<vmem>>, vector<8x32xf32>,
    %68 = vector.extract_strided_slice %61 {offsets = [0, 32], sizes = [8, 32], strides = [1, 1]} : vector<8x64xf32> to vector<8x32xf32>
    %c0_50 = arith.constant 0 : index
    %c32 = arith.constant 32 : index
    %69 = vector.load %arg18[%c0_50, %c32] : memref<8x64xf32, #tpu.memory_space<vmem>>, vector<8x32xf32>
    tpu.vector_store %arg18[%c0_50, %c32], %68 {strides = array<i32>} : memref<8x64xf32, #tpu.memory_space<vmem>>, vector<8x32xf32>,
    return
  }
  func.func @transform_0(%arg0: i32) -> (i32, i32) {
    %c0_i32 = arith.constant 0 : i32
    %c0_i32_0 = arith.constant 0 : i32
    return %arg0, %c0_i32 : i32, i32
  }
  func.func @transform_1(%arg0: i32) -> (i32, i32) {
    %c0_i32 = arith.constant 0 : i32
    %c0_i32_0 = arith.constant 0 : i32
    %c0_i32_1 = arith.constant 0 : i32
    return %c0_i32, %c0_i32_0 : i32, i32
  }
  func.func @transform_2(%arg0: i32) -> (i32, i32) {
    %c0_i32 = arith.constant 0 : i32
    %c0_i32_0 = arith.constant 0 : i32
    %c0_i32_1 = arith.constant 0 : i32
    return %c0_i32, %c0_i32_0 : i32, i32
  }
  func.func @transform_3(%arg0: i32) -> (i32, i32) {
    %c0_i32 = arith.constant 0 : i32
    %c0_i32_0 = arith.constant 0 : i32
    %c0_i32_1 = arith.constant 0 : i32
    return %c0_i32, %c0_i32_0 : i32, i32
  }
  func.func @transform_4(%arg0: i32) -> (i32, i32) {
    %c0_i32 = arith.constant 0 : i32
    %c0_i32_0 = arith.constant 0 : i32
    %c0_i32_1 = arith.constant 0 : i32
    return %c0_i32, %c0_i32_0 : i32, i32
  }
  func.func @transform_5(%arg0: i32) -> (i32, i32) {
    %c0_i32 = arith.constant 0 : i32
    %c0_i32_0 = arith.constant 0 : i32
    %c0_i32_1 = arith.constant 0 : i32
    return %c0_i32, %c0_i32_0 : i32, i32
  }
  func.func @transform_6(%arg0: i32) -> (i32, i32) {
    %c0_i32 = arith.constant 0 : i32
    %c0_i32_0 = arith.constant 0 : i32
    %c0_i32_1 = arith.constant 0 : i32
    return %c0_i32, %c0_i32_0 : i32, i32
  }
  func.func @transform_7(%arg0: i32) -> (i32, i32) {
    %c0_i32 = arith.constant 0 : i32
    %c0_i32_0 = arith.constant 0 : i32
    %c0_i32_1 = arith.constant 0 : i32
    return %c0_i32, %c0_i32_0 : i32, i32
  }
  func.func @transform_8(%arg0: i32) -> (i32, i32) {
    %c0_i32 = arith.constant 0 : i32
    %c0_i32_0 = arith.constant 0 : i32
    %c0_i32_1 = arith.constant 0 : i32
    return %c0_i32, %c0_i32_0 : i32, i32
  }
  func.func @transform_9(%arg0: i32) -> (i32, i32) {
    %c0_i32 = arith.constant 0 : i32
    %c0_i32_0 = arith.constant 0 : i32
    %c0_i32_1 = arith.constant 0 : i32
    return %c0_i32, %c0_i32_0 : i32, i32
  }
  func.func @transform_10(%arg0: i32) -> (i32, i32) {
    %c0_i32 = arith.constant 0 : i32
    %c0_i32_0 = arith.constant 0 : i32
    %c0_i32_1 = arith.constant 0 : i32
    return %c0_i32, %c0_i32_0 : i32, i32
  }
  func.func @transform_11(%arg0: i32) -> (i32, i32) {
    %c0_i32 = arith.constant 0 : i32
    %c0_i32_0 = arith.constant 0 : i32
    %c0_i32_1 = arith.constant 0 : i32
    return %c0_i32, %c0_i32_0 : i32, i32
  }
  func.func @transform_12(%arg0: i32) -> (i32, i32) {
    %c0_i32 = arith.constant 0 : i32
    %c0_i32_0 = arith.constant 0 : i32
    %c0_i32_1 = arith.constant 0 : i32
    return %c0_i32, %c0_i32_0 : i32, i32
  }
  func.func @transform_13(%arg0: i32) -> (i32, i32) {
    %c0_i32 = arith.constant 0 : i32
    %c0_i32_0 = arith.constant 0 : i32
    %c0_i32_1 = arith.constant 0 : i32
    return %c0_i32, %c0_i32_0 : i32, i32
  }
  func.func @transform_14(%arg0: i32) -> (i32, i32) {
    %c0_i32 = arith.constant 0 : i32
    %c0_i32_0 = arith.constant 0 : i32
    %c0_i32_1 = arith.constant 0 : i32
    return %c0_i32, %c0_i32_0 : i32, i32
  }
  func.func @transform_15(%arg0: i32) -> (i32, i32) {
    %c0_i32 = arith.constant 0 : i32
    %c0_i32_0 = arith.constant 0 : i32
    %c0_i32_1 = arith.constant 0 : i32
    return %c0_i32, %c0_i32_0 : i32, i32
  }
  func.func @transform_16(%arg0: i32) -> (i32, i32) {
    %c0_i32 = arith.constant 0 : i32
    %c0_i32_0 = arith.constant 0 : i32
    %c0_i32_1 = arith.constant 0 : i32
    return %c0_i32, %c0_i32_0 : i32, i32
  }
  func.func @transform_17(%arg0: i32) -> (i32, i32) {
    %c0_i32 = arith.constant 0 : i32
    %c0_i32_0 = arith.constant 0 : i32
    return %arg0, %c0_i32 : i32, i32
  }
}

</mosaic_0001>

<bundles_post_ra>
// kernel: tpu_custom_call.1
= control target key start
LH: loop header
LB: loop body
LE: loop exit
PB: predicated region body
PF: predicated region fallthrough
CT: control target
= control target key end

     0   :  { %s1084_s0 = inlined_call_operand.vmem [shape: f32[8,48], index: 0, kind: input, shape index: {}]   ;;  %s1085_s1 = inlined_call_operand.hbm [shape: f32[48,256], index: 1, kind: input, shape index: {}]   ;;  %s1086_s2 = inlined_call_operand.vmem [shape: f32[1,256], index: 2, kind: input, shape index: {}]   ;;  %s1087_s3 = inlined_call_operand.hbm [shape: f32[256,128], index: 3, kind: input, shape index: {}]   ;;  %s1088_s4 = inlined_call_operand.vmem [shape: f32[1,128], index: 4, kind: input, shape index: {}]   ;;  %s1089_s5 = inlined_call_operand.vmem [shape: f32[128,128], index: 5, kind: input, shape index: {}]   ;;  %s1090_s6 = inlined_call_operand.vmem [shape: f32[1,128], index: 6, kind: input, shape index: {}]   ;;  %s1091_s7 = inlined_call_operand.hbm [shape: f32[128,256], index: 7, kind: input, shape index: {}]   ;;  %s1092_s8 = inlined_call_operand.vmem [shape: f32[1,256], index: 8, kind: input, shape index: {}]   ;;  %s1093_s9 = inlined_call_operand.hbm [shape: f32[256,128], index: 9, kind: input, shape index: {}]   ;;  %s1094_s10 = inlined_call_operand.vmem [shape: f32[1,128], index: 10, kind: input, shape index: {}]   ;;  %s1095_s11 = inlined_call_operand.hbm [shape: f32[128,128], index: 11, kind: input, shape index: {}]   ;;  %s1096_s12 = inlined_call_operand.vmem [shape: f32[1,128], index: 12, kind: input, shape index: {}]   ;;  %s1097_s13 = inlined_call_operand.vmem [shape: f32[128,64], index: 13, kind: input, shape index: {}]   ;;  %s1098_s14 = inlined_call_operand.vmem [shape: f32[1,64], index: 14, kind: input, shape index: {}]   ;;  %s1099_s15 = inlined_call_operand.vmem [shape: f32[32,64], index: 15, kind: input, shape index: {}]   ;;  %s1100_s16 = inlined_call_operand.vmem [shape: f32[1,64], index: 16, kind: input, shape index: {}]   ;;  %s1101_s17 = inlined_call_operand.hbm [shape: f32[8,64], index: 17, kind: output, shape index: {}]  }
   0x1   :  { %1102 = sst [smem:[#allocation16_spill]] %s1084_s0 }
   0x2   :  { %1103 = sst [smem:[#allocation17_spill]] %s1085_s1 }
   0x3   :  { %22 = vsyncpa [#allocation3], 0 }
   0x4   :  { %23 = vsyncpa [#allocation6], 0 }
   0x5   :  { %24 = vsyncpa [#allocation9], 0  ;;  %s47_s26 = sshll.u32 %s1087_s3, 4  ;;  %s48_s26 = int_to_ptr.hbm [resolvable:$true] %s47_s26 }
   0x6   :  { %25 = vsyncpa [#allocation4], 0  ;;  %s816_s27 = smov [#allocation5]   ;;  %s81_s30 = sshll.u32 %s1093_s9, 4  ;;  %s82_s30 = int_to_ptr.hbm [resolvable:$true] %s81_s30 }
   0x7   :  { %s49_s28 = sshll.u32 %s816_s27, 4  ;;  %s817_s18 = smov 128   ;;  %s50_s28 = int_to_ptr.vmem [resolvable:$true] %s49_s28 }
   0x8   :  { %s818_s19 = smov 8   ;;  %s819_s1 = smov [#allocation8]  }
   0x9   :  { %55 = dma.hbm_to_vmem [thread:$0]  %s48_s26, 4096, %s50_s28, [#allocation6], %s817_s18, %s817_s18, %s818_s19  }
   0xa   :  { %s83_s20 = sshll.u32 %s819_s1, 4  ;;  %s1104_s22 = sld [smem:[#allocation17_spill]]  ;;  %s84_s20 = int_to_ptr.vmem [resolvable:$true] %s83_s20 }
   0xb   :  { %89 = dma.hbm_to_vmem [thread:$0]  %s82_s30, 4096, %s84_s20, [#allocation9], %s817_s18, %s817_s18, %s818_s19  }
   0xc   :  { %s820_s9 = smov [#allocation2]   ;;  %s66_s26 = sshll.u32 %s1091_s7, 4  ;;  %s67_s26 = int_to_ptr.hbm [resolvable:$true] %s66_s26 }
   0xd   :  { %s34_s24 = sshll.u32 %s820_s9, 4  ;;  %s821_s28 = smov 256   ;;  %s35_s24 = int_to_ptr.vmem [resolvable:$true] %s34_s24 }
   0xe   :  { %s822_s29 = smov 16   ;;  %s823_s0 = smov [#allocation7]  }
   0xf   :  { %s68_s1 = sshll.u32 %s823_s0, 4  ;;  %s824_s30 = smov [#allocation10]   ;;  %s69_s1 = int_to_ptr.vmem [resolvable:$true] %s68_s1 }
  0x10   :  { %s32_s23 = sshll.u32 %s1104_s22, 4  ;;  %s96_s22 = sshll.u32 %s1095_s11, 4  ;;  %s33_s23 = int_to_ptr.hbm [resolvable:$true] %s32_s23  ;;  %s97_s22 = int_to_ptr.hbm [resolvable:$true] %s96_s22 }
  0x11   :  { %40 = dma.hbm_to_vmem [thread:$0]  %s33_s23, 1536, %s35_s24, [#allocation3], %s821_s28, %s821_s28, %s822_s29  }
  0x12   :  { %74 = dma.hbm_to_vmem [thread:$0]  %s67_s26, 4096, %s69_s1, [#allocation6], %s821_s28, %s821_s28, %s822_s29  }
  0x13   :  { %s98_s20 = sshll.u32 %s824_s30, 4  ;;  %s99_s20 = int_to_ptr.vmem [resolvable:$true] %s98_s20 }
  0x14   :  { %104 = dma.hbm_to_vmem [thread:$0]  %s97_s22, 2048, %s99_s20, [#allocation9], %s817_s18, %s817_s18, %s818_s19  }
  0x15   :  { %808 = dma.done.wait [#allocation3], 1536  }
  0x16   :  { %809 = vsyncadd [#allocation3], 4294965760 }
  0x17   :  { %810 = dma.done.wait [#allocation6], 8192  }
  0x18   :  { %811 = vsyncadd [#allocation6], 4294959104 }
  0x19   :  { %812 = dma.done.wait [#allocation9], 6144  }
  0x1a   :  { %813 = vsyncadd [#allocation9], 4294961152  ;;  %v146_v0 = vld [vmem:[#allocation2 + $0x50] sm:$0xff]  ;;  %v144_v1 = vld [vmem:[#allocation2 + $0x40] sm:$0xff]  ;;  %s1105_s18 = sld [smem:[#allocation16_spill]]  ;;  %vm154_vm0 = vcmask 392192  }
  0x1b   :  { %v147_v2 = vld [vmem:[#allocation2 + $0x58] sm:$0xff]  ;;  %168 = vmatpush.msra.mxu0 %v146_v0  ;;  %v145_v3 = vld [vmem:[#allocation2 + $0x48] sm:$0xff]  ;;  %v142_v4 = vld [vmem:[#allocation2 + $0x30] sm:$0xff]  ;;  %s825_s22 = smov 96   ;;  %vm589_vm5 = vcmask 261120   ;;  %vm616_vm6 = vcmask 523520  }
  0x1c   :  { %188 = vmatpush.msra.mxu1 %v147_v2  ;;  %v143_v5 = vld [vmem:[#allocation2 + $0x38] sm:$0xff]  ;;  %v140_v6 = vld [vmem:[#allocation2 + $0x20] sm:$0xff]  ;;  %v141_v7 = vld [vmem:[#allocation2 + $0x28] sm:$0xff] }
  0x1d   :  { %169 = vmatpush.msra.mxu0 %v144_v1  ;;  %v215_v8 = vld [vmem:[#allocation5 + $0x78] sm:$0xff]  ;;  %v214_v9 = vld [vmem:[#allocation5 + $0x70] sm:$0xff]  ;;  %v213_v14 = vld [vmem:[#allocation5 + $0x68] sm:$0xff] }
  0x1e   :  { %189 = vmatpush.msra.mxu1 %v145_v3  ;;  %v231_v10 = vld [vmem:[#allocation5 + $0xf8] sm:$0xff]  ;;  %v230_v11 = vld [vmem:[#allocation5 + $0xf0] sm:$0xff]  ;;  %236 = vmatpush.msra.mxu2 %v215_v8  ;;  %v229_v15 = vld [vmem:[#allocation5 + $0xe8] sm:$0xff] }
  0x1f   :  { %170 = vmatpush.msra.mxu0 %v142_v4  ;;  %v138_v12 = vld [vmem:[#allocation2 + $0x10] sm:$0xff]  ;;  %v139_v13 = vld [vmem:[#allocation2 + $0x18] sm:$0xff]  ;;  %256 = vmatpush.msra.mxu3 %v231_v10  ;;  %v136_v16 = vld [vmem:[#allocation2] sm:$0xff] }
  0x20   :  { %190 = vmatpush.msra.mxu1 %v143_v5  ;;  %v137_v17 = vld [vmem:[#allocation2 + $0x8] sm:$0xff]  ;;  %237 = vmatpush.msra.mxu2 %v214_v9  ;;  %v944_v18 = vld [vmem:[%s1105_s18] sm:$0xff]  ;;  %v211_v21 = vld [vmem:[#allocation5 + $0x58] sm:$0xff] }
  0x21   :  { %171 = vmatpush.msra.mxu0 %v140_v6  ;;  %257 = vmatpush.msra.mxu3 %v230_v11  ;;  %v212_v19 = vld [vmem:[#allocation5 + $0x60] sm:$0xff]  ;;  %v210_v22 = vld [vmem:[#allocation5 + $0x50] sm:$0xff]  ;;  %v227_v23 = vld [vmem:[#allocation5 + $0xd8] sm:$0xff] }
  0x22   :  { %191 = vmatpush.msra.mxu1 %v141_v7  ;;  %238 = vmatpush.msra.mxu2 %v213_v14  ;;  %v228_v20 = vld [vmem:[#allocation5 + $0xe0] sm:$0xff]  ;;  %v226_v24 = vld [vmem:[#allocation5 + $0xd0] sm:$0xff]  ;;  %v209_v25 = vld [vmem:[#allocation5 + $0x48] sm:$0xff] }
  0x23   :  { %172 = vmatpush.msra.mxu0 %v138_v12  ;;  %258 = vmatpush.msra.mxu3 %v229_v15  ;;  %v225_v26 = vld [vmem:[#allocation5 + $0xc8] sm:$0xff]  ;;  %v208_v27 = vld [vmem:[#allocation5 + $0x40] sm:$0xff]  ;;  %v207_v29 = vld [vmem:[#allocation5 + $0x38] sm:$0xff] }
  0x24   :  { %192 = vmatpush.msra.mxu1 %v139_v13  ;;  %239 = vmatpush.msra.mxu2 %v212_v19  ;;  %v224_v28 = vld [vmem:[#allocation5 + $0xc0] sm:$0xff]  ;;  %v223_v30 = vld [vmem:[#allocation5 + $0xb8] sm:$0xff]  ;;  %v206_v31 = vld [vmem:[#allocation5 + $0x30] sm:$0xff] }
  0x25   :  { %173 = vmatpush.msra.mxu0 %v136_v16  ;;  %259 = vmatpush.msra.mxu3 %v228_v20  ;;  %v222_v32 = vld [vmem:[#allocation5 + $0xb0] sm:$0xff]  ;;  %v205_v33 = vld [vmem:[#allocation5 + $0x28] sm:$0xff]  ;;  %v204_v35 = vld [vmem:[#allocation5 + $0x20] sm:$0xff] }
  0x26   :  { %193 = vmatpush.msra.mxu1 %v137_v17  ;;  %637 = vmatmul.msk.f32.vlgmr.msra.gmra.mxu0 %vm154_vm0, %v944_v18  ;;  %v221_v34 = vld [vmem:[#allocation5 + $0xa8] sm:$0xff]  ;;  %v220_v36 = vld [vmem:[#allocation5 + $0xa0] sm:$0xff]  ;;  %v203_v37 = vld [vmem:[#allocation5 + $0x18] sm:$0xff] }
  0x27   :  { %638 = vmatmul.msk.f32.vlgmr.msra.gmra.mxu1 %vm154_vm0, %v944_v18  ;;  %240 = vmatpush.msra.mxu2 %v211_v21  ;;  %v202_v38 = vld [vmem:[#allocation5 + $0x10] sm:$0xff]  ;;  %v219_v39 = vld [vmem:[#allocation5 + $0x98] sm:$0xff]  ;;  %v201_v40 = vld [vmem:[#allocation5 + $0x8] sm:$0xff] }
  0x28   :  { %260 = vmatpush.msra.mxu3 %v227_v23  ;;  %v218_v41 = vld [vmem:[#allocation5 + $0x90] sm:$0xff]  ;;  %v200_v42 = vld [vmem:[#allocation5] sm:$0xff]  ;;  %v217_v43 = vld [vmem:[#allocation5 + $0x88] sm:$0xff] }
  0x29   :  { %241 = vmatpush.msra.mxu2 %v210_v22  ;;  %v216_v44 = vld [vmem:[#allocation5 + $0x80] sm:$0xff]  ;;  %v292_v45 = vld [vmem:[%s1089_s5 + $0x78] sm:$0xff]  ;;  %v291_v46 = vld [vmem:[%s1089_s5 + $0x70] sm:$0xff] }
  0x2a   :  { %261 = vmatpush.msra.mxu3 %v226_v24  ;;  %297 = vmatpush.msrb.mxu0 %v292_v45  ;;  %v290_v47 = vld [vmem:[%s1089_s5 + $0x68] sm:$0xff]  ;;  %v289_v48 = vld [vmem:[%s1089_s5 + $0x60] sm:$0xff]  ;;  %v288_v49 = vld [vmem:[%s1089_s5 + $0x58] sm:$0xff] }
  0x2b   :  { %242 = vmatpush.msra.mxu2 %v209_v25  ;;  %v287_v50 = vld [vmem:[%s1089_s5 + $0x50] sm:$0xff]  ;;  %v286_v51 = vld [vmem:[%s1089_s5 + $0x48] sm:$0xff]  ;;  %v285_v52 = vld [vmem:[%s1089_s5 + $0x40] sm:$0xff] }
  0x2c   :  { %262 = vmatpush.msra.mxu3 %v225_v26  ;;  %298 = vmatpush.msrb.mxu0 %v291_v46  ;;  %v284_v53 = vld [vmem:[%s1089_s5 + $0x38] sm:$0xff]  ;;  %v283_v54 = vld [vmem:[%s1089_s5 + $0x30] sm:$0xff]  ;;  %v282_v55 = vld [vmem:[%s1089_s5 + $0x28] sm:$0xff] }
  0x2d   :  { %243 = vmatpush.msra.mxu2 %v208_v27  ;;  %v281_v56 = vld [vmem:[%s1089_s5 + $0x20] sm:$0xff]  ;;  %v280_v2 = vld [vmem:[%s1089_s5 + $0x18] sm:$0xff]  ;;  %v279_v3 = vld [vmem:[%s1089_s5 + $0x10] sm:$0xff] }
  0x2e   :  { %263 = vmatpush.msra.mxu3 %v224_v28  ;;  %299 = vmatpush.msrb.mxu0 %v290_v47  ;;  %v148_v57 = vld [vmem:[%s1086_s2] sm:$0x3]  ;;  %v278_v4 = vld [vmem:[%s1089_s5 + $0x8] sm:$0xff]  ;;  %v348_v6 = vld [vmem:[#allocation7 + $0xf0] sm:$0xff] }
  0x2f   :  { %244 = vmatpush.msra.mxu2 %v207_v29  ;;  %v150_v58 = vperm.slane %v148_v57, 0  ;;  %v151_v59 = vperm.slane %v148_v57, 1  ;;  %v277_v5 = vld [vmem:[%s1089_s5] sm:$0xff]  ;;  %v349_v7 = vld [vmem:[#allocation7 + $0xf8] sm:$0xff]  ;;  %356 = vmatpush.msrb.mxu1 %v348_v6  ;;  %v347_v9 = vld [vmem:[#allocation7 + $0xe8] sm:$0xff] }
  0x30   :  { %264 = vmatpush.msra.mxu3 %v223_v30  ;;  %300 = vmatpush.msrb.mxu0 %v289_v48  ;;  %v346_v8 = vld [vmem:[#allocation7 + $0xe0] sm:$0xff]  ;;  %v344_v10 = vld [vmem:[#allocation7 + $0xd0] sm:$0xff]  ;;  %v345_v11 = vld [vmem:[#allocation7 + $0xd8] sm:$0xff] }
  0x31   :  { %245 = vmatpush.msra.mxu2 %v206_v31  ;;  %357 = vmatpush.msrb.mxu1 %v346_v8  ;;  %v342_v12 = vld [vmem:[#allocation7 + $0xc0] sm:$0xff]  ;;  %v343_v13 = vld [vmem:[#allocation7 + $0xc8] sm:$0xff]  ;;  %v340_v14 = vld [vmem:[#allocation7 + $0xb0] sm:$0xff] }
  0x32   :  { %265 = vmatpush.msra.mxu3 %v222_v32  ;;  %301 = vmatpush.msrb.mxu0 %v288_v49  ;;  %v341_v15 = vld [vmem:[#allocation7 + $0xb8] sm:$0xff]  ;;  %v338_v16 = vld [vmem:[#allocation7 + $0xa0] sm:$0xff]  ;;  %v339_v17 = vld [vmem:[#allocation7 + $0xa8] sm:$0xff] }
  0x33   :  { %246 = vmatpush.msra.mxu2 %v205_v33  ;;  %358 = vmatpush.msrb.mxu1 %v344_v10  ;;  %v336_v19 = vld [vmem:[#allocation7 + $0x90] sm:$0xff]  ;;  %v337_v20 = vld [vmem:[#allocation7 + $0x98] sm:$0xff]  ;;  %v334_v21 = vld [vmem:[#allocation7 + $0x80] sm:$0xff] }
  0x34   :  { %266 = vmatpush.msra.mxu3 %v221_v34  ;;  %302 = vmatpush.msrb.mxu0 %v287_v50  ;;  %v335_v22 = vld [vmem:[#allocation7 + $0x88] sm:$0xff]  ;;  %v332_v23 = vld [vmem:[#allocation7 + $0x70] sm:$0xff]  ;;  %v333_v24 = vld [vmem:[#allocation7 + $0x78] sm:$0xff] }
  0x35   :  { %247 = vmatpush.msra.mxu2 %v204_v35  ;;  %359 = vmatpush.msrb.mxu1 %v342_v12  ;;  %v330_v25 = vld [vmem:[#allocation7 + $0x60] sm:$0xff]  ;;  %v331_v26 = vld [vmem:[#allocation7 + $0x68] sm:$0xff]  ;;  %v328_v27 = vld [vmem:[#allocation7 + $0x50] sm:$0xff] }
  0x36   :  { %267 = vmatpush.msra.mxu3 %v220_v36  ;;  %303 = vmatpush.msrb.mxu0 %v286_v51  ;;  %v329_v28 = vld [vmem:[#allocation7 + $0x58] sm:$0xff]  ;;  %v326_v29 = vld [vmem:[#allocation7 + $0x40] sm:$0xff]  ;;  %v327_v30 = vld [vmem:[#allocation7 + $0x48] sm:$0xff] }
  0x37   :  { %248 = vmatpush.msra.mxu2 %v203_v37  ;;  %360 = vmatpush.msrb.mxu1 %v340_v14  ;;  %v652_v31 = vld [vmem:[%s1088_s4] ss:$0 sm:$0xff]  ;;  %v324_v32 = vld [vmem:[#allocation7 + $0x30] sm:$0xff]  ;;  %v325_v33 = vld [vmem:[#allocation7 + $0x38] sm:$0xff]  ;;  %s826_s4 = smov [#allocation11]  }
  0x38   :  { %268 = vmatpush.msra.mxu3 %v219_v39  ;;  %304 = vmatpush.msrb.mxu0 %v285_v52  ;;  %v322_v39 = vld [vmem:[#allocation7 + $0x20] sm:$0xff]  ;;  %v413_v45 = vld [vmem:[#allocation8 + $0x78] sm:$0xff]  ;;  %v412_v46 = vld [vmem:[#allocation8 + $0x70] sm:$0xff]  ;;  %s623_s20 = sshll.u32 %s826_s4, 4  ;;  %s624_s20 = int_to_ptr.vmem [resolvable:$true] %s623_s20 }
  0x39   :  { %249 = vmatpush.msra.mxu2 %v202_v38  ;;  %361 = vmatpush.msrb.mxu1 %v338_v16  ;;  %v429_v47 = vld [vmem:[#allocation8 + $0xf8] sm:$0xff]  ;;  %v411_v48 = vld [vmem:[#allocation8 + $0x68] sm:$0xff]  ;;  %v428_v49 = vld [vmem:[#allocation8 + $0xf0] sm:$0xff] }
  0x3a   :  { %269 = vmatpush.msra.mxu3 %v218_v41  ;;  %305 = vmatpush.msrb.mxu0 %v284_v53  ;;  %v320_v41 = vld [vmem:[#allocation7 + $0x10] sm:$0xff]  ;;  %v427_v50 = vld [vmem:[#allocation8 + $0xe8] sm:$0xff]  ;;  %v410_v51 = vld [vmem:[#allocation8 + $0x60] sm:$0xff] }
  0x3b   :  { %250 = vmatpush.msra.mxu2 %v201_v40  ;;  %362 = vmatpush.msrb.mxu1 %v336_v19  ;;  %v323_v40 = vld [vmem:[#allocation7 + $0x28] sm:$0xff]  ;;  %v426_v52 = vld [vmem:[#allocation8 + $0xe0] sm:$0xff]  ;;  %v409_v53 = vld [vmem:[#allocation8 + $0x58] sm:$0xff] }
  0x3c   :  { %270 = vmatpush.msra.mxu3 %v217_v43  ;;  %306 = vmatpush.msrb.mxu0 %v283_v54  ;;  %v318_v43 = vld [vmem:[#allocation7] sm:$0xff]  ;;  %v425_v54 = vld [vmem:[#allocation8 + $0xd8] sm:$0xff]  ;;  %v407_v57 = vld [vmem:[#allocation8 + $0x48] sm:$0xff] }
  0x3d   :  { %251 = vmatpush.msra.mxu2 %v200_v42  ;;  %363 = vmatpush.msrb.mxu1 %v334_v21  ;;  %v321_v42 = vld [vmem:[#allocation7 + $0x18] sm:$0xff]  ;;  %v400_v8 = vld [vmem:[#allocation8 + $0x10] sm:$0xff]  ;;  %v399_v10 = vld [vmem:[#allocation8 + $0x8] sm:$0xff] }
  0x3e   :  { %271 = vmatpush.msra.mxu3 %v216_v44  ;;  %307 = vmatpush.msrb.mxu0 %v282_v55  ;;  %v319_v44 = vld [vmem:[#allocation7 + $0x8] sm:$0xff]  ;;  %v408_v55 = vld [vmem:[#allocation8 + $0x50] sm:$0xff]  ;;  %v398_v12 = vld [vmem:[#allocation8] sm:$0xff] }
  0x3f   :  { %376 = vmatpush.msrb.mxu2 %v349_v7  ;;  %364 = vmatpush.msrb.mxu1 %v332_v23  ;;  %v416_v14 = vld [vmem:[#allocation8 + $0x90] sm:$0xff]  ;;  %v414_v16 = vld [vmem:[#allocation8 + $0x80] sm:$0xff] }
  0x40   :  { %308 = vmatpush.msrb.mxu0 %v281_v56  ;;  %434 = vmatpush.msrb.mxu3 %v413_v45  ;;  %v424_v56 = vld [vmem:[#allocation8 + $0xd0] sm:$0xff]  ;;  %v487_v21 = vld [vmem:[#allocation10 + $0x60] sm:$0xff]  ;;  %v529_v45 = vld [vmem:[%s1097_s13 + $0x68] sm:$0xff] }
  0x41   :  { %377 = vmatpush.msrb.mxu2 %v347_v9  ;;  %365 = vmatpush.msrb.mxu1 %v330_v25  ;;  %v419_v9 = vld [vmem:[#allocation8 + $0xa8] sm:$0xff]  ;;  %v489_v19 = vld [vmem:[#allocation10 + $0x70] sm:$0xff]  ;;  %v483_v25 = vld [vmem:[#allocation10 + $0x40] sm:$0xff] }
  0x42   :  { %309 = vmatpush.msrb.mxu0 %v280_v2  ;;  %435 = vmatpush.msrb.mxu3 %v412_v46  ;;  %v402_v2 = vld [vmem:[#allocation8 + $0x20] sm:$0xff]  ;;  %v485_v23 = vld [vmem:[#allocation10 + $0x50] sm:$0xff] }
  0x43   :  { %378 = vmatpush.msrb.mxu2 %v345_v11  ;;  %366 = vmatpush.msrb.mxu1 %v328_v27  ;;  %v418_v11 = vld [vmem:[#allocation8 + $0xa0] sm:$0xff] }
  0x44   :  { %310 = vmatpush.msrb.mxu0 %v279_v3  ;;  %436 = vmatpush.msrb.mxu3 %v411_v48  ;;  %v401_v3 = vld [vmem:[#allocation8 + $0x18] sm:$0xff]  ;;  %v350_v27 = vld [vmem:[%s1092_s8] sm:$0x3]  ;;  %v526_v48 = vld [vmem:[%s1097_s13 + $0x50] sm:$0xff]  ;;  %s625_s8 = sshll.u32 %s1101_s17, 4  ;;  %s626_s8 = int_to_ptr.hbm [resolvable:$true] %s625_s8 }
  0x45   :  { %379 = vmatpush.msrb.mxu2 %v343_v13  ;;  %367 = vmatpush.msrb.mxu1 %v326_v29  ;;  %v417_v13 = vld [vmem:[#allocation8 + $0x98] sm:$0xff]  ;;  %v352_v29 = vperm.slane %v350_v27, 0  ;;  %v528_v46 = vld [vmem:[%s1097_s13 + $0x60] sm:$0xff] }
  0x46   :  { %311 = vmatpush.msrb.mxu0 %v278_v4  ;;  %437 = vmatpush.msrb.mxu3 %v410_v51  ;;  %v653_v4 = vld [vmem:[%s1090_s6] ss:$0 sm:$0xff]  ;;  %v523_v51 = vld [vmem:[%s1097_s13 + $0x38] sm:$0xff] }
  0x47   :  { %380 = vmatpush.msrb.mxu2 %v341_v15  ;;  %368 = vmatpush.msrb.mxu1 %v324_v32  ;;  %v415_v15 = vld [vmem:[#allocation8 + $0x88] sm:$0xff] }
  0x48   :  { %312 = vmatpush.msrb.mxu0 %v277_v5  ;;  %438 = vmatpush.msrb.mxu3 %v409_v53  ;;  %v521_v53 = vld [vmem:[%s1097_s13 + $0x28] sm:$0xff] }
  0x49   :  { %381 = vmatpush.msrb.mxu2 %v339_v17  ;;  %369 = vmatpush.msrb.mxu1 %v322_v39  ;;  %v490_v17 = vld [vmem:[#allocation10 + $0x78] sm:$0xff] }
  0x4a   :  { %454 = vmatpush.msra.mxu0 %v429_v47  ;;  %439 = vmatpush.msrb.mxu3 %v408_v55  ;;  %v478_v39 = vld [vmem:[#allocation10 + $0x18] sm:$0xff]  ;;  %v654_v55 = vld [vmem:[%s1094_s10] ss:$0 sm:$0xff] }
  0x4b   :  { %382 = vmatpush.msrb.mxu2 %v337_v20  ;;  %370 = vmatpush.msrb.mxu1 %v320_v41  ;;  %v488_v20 = vld [vmem:[#allocation10 + $0x68] sm:$0xff]  ;;  %v527_v47 = vld [vmem:[%s1097_s13 + $0x58] sm:$0xff] }
  0x4c   :  { %455 = vmatpush.msra.mxu0 %v428_v49  ;;  %440 = vmatpush.msrb.mxu3 %v407_v57  ;;  %v476_v41 = vld [vmem:[#allocation10 + $0x8] sm:$0xff] }
  0x4d   :  { %383 = vmatpush.msrb.mxu2 %v335_v22  ;;  %371 = vmatpush.msrb.mxu1 %v318_v43  ;;  %v486_v22 = vld [vmem:[#allocation10 + $0x58] sm:$0xff]  ;;  %v525_v49 = vld [vmem:[%s1097_s13 + $0x48] sm:$0xff] }
  0x4e   :  { %456 = vmatpush.msra.mxu0 %v427_v50  ;;  %v531_v43 = vld [vmem:[%s1097_s13 + $0x78] sm:$0xff]  ;;  %v524_v50 = vld [vmem:[%s1097_s13 + $0x40] sm:$0xff] }
  0x4f   :  { %384 = vmatpush.msrb.mxu2 %v333_v24  ;;  %495 = vmatpush.msra.mxu1 %v490_v17  ;;  %v484_v24 = vld [vmem:[#allocation10 + $0x48] sm:$0xff] }
  0x50   :  { %457 = vmatpush.msra.mxu0 %v426_v52  ;;  %v522_v52 = vld [vmem:[%s1097_s13 + $0x30] sm:$0xff] }
  0x51   :  { %385 = vmatpush.msrb.mxu2 %v331_v26  ;;  %496 = vmatpush.msra.mxu1 %v489_v19  ;;  %v482_v26 = vld [vmem:[#allocation10 + $0x38] sm:$0xff] }
  0x52   :  { %458 = vmatpush.msra.mxu0 %v425_v54  ;;  %v520_v54 = vld [vmem:[%s1097_s13 + $0x20] sm:$0xff] }
  0x53   :  { %386 = vmatpush.msrb.mxu2 %v329_v28  ;;  %497 = vmatpush.msra.mxu1 %v488_v20  ;;  %v481_v28 = vld [vmem:[#allocation10 + $0x30] sm:$0xff] }
  0x54   :  { %459 = vmatpush.msra.mxu0 %v424_v56  ;;  %v519_v56 = vld [vmem:[%s1097_s13 + $0x18] sm:$0xff] }
  0x55   :  { %387 = vmatpush.msrb.mxu2 %v327_v30  ;;  %498 = vmatpush.msra.mxu1 %v487_v21  ;;  %v480_v30 = vld [vmem:[#allocation10 + $0x28] sm:$0xff] }
  0x57   :  { %388 = vmatpush.msrb.mxu2 %v325_v33  ;;  %499 = vmatpush.msra.mxu1 %v486_v22 }
  0x59   :  { %389 = vmatpush.msrb.mxu2 %v323_v40  ;;  %500 = vmatpush.msra.mxu1 %v485_v23  ;;  %v477_v40 = vld [vmem:[#allocation10 + $0x10] sm:$0xff] }
  0x5b   :  { %390 = vmatpush.msrb.mxu2 %v321_v42  ;;  %501 = vmatpush.msra.mxu1 %v484_v24  ;;  %v475_v42 = vld [vmem:[#allocation10] sm:$0xff] }
  0x5d   :  { %391 = vmatpush.msrb.mxu2 %v319_v44  ;;  %502 = vmatpush.msra.mxu1 %v483_v25  ;;  %v530_v44 = vld [vmem:[%s1097_s13 + $0x70] sm:$0xff] }
  0x5f   :  { %503 = vmatpush.msra.mxu1 %v482_v26 }
  0x61   :  { %504 = vmatpush.msra.mxu1 %v481_v28 }
  0x63   :  { %505 = vmatpush.msra.mxu1 %v480_v30  ;;  %v613_v30 = vmul.f32 0.70710677, %v944_v18 }
  0xa3   :  { %v175_v60 = vpop.f32.mrf.mxu0 }
  0xa4   :  { %v195_v61 = vpop.f32.mrf.mxu1  ;;  %v176_v62 = vadd.f32 %v175_v60, %v150_v58  ;;  %v423_v58 = vld [vmem:[#allocation8 + $0xc8] sm:$0xff]  ;;  %v422_v60 = vld [vmem:[#allocation8 + $0xc0] sm:$0xff] }
  0xa5   :  { %v196_v63 = vadd.f32 %v195_v61, %v151_v59  ;;  %v406_v59 = vld [vmem:[#allocation8 + $0x40] sm:$0xff]  ;;  %v405_v61 = vld [vmem:[#allocation8 + $0x38] sm:$0xff]  ;;  %460 = vmatpush.msra.mxu0 %v423_v58 }
  0xa6   :  { %v198_v0 = vmax.f32 %v176_v62, 0.0  ;;  %441 = vmatpush.msrb.mxu3 %v406_v59  ;;  %v421_v62 = vld [vmem:[#allocation8 + $0xb8] sm:$0xff] }
  0xa7   :  { %v199_v1 = vmax.f32 %v196_v63, 0.0  ;;  %v404_v63 = vld [vmem:[#allocation8 + $0x30] sm:$0xff]  ;;  %461 = vmatpush.msra.mxu0 %v422_v60 }
  0xa8   :  { %252 = vmatmul.f32.vlgmr.msra.gmra.mxu2 %v198_v0  ;;  %442 = vmatpush.msrb.mxu3 %v405_v61  ;;  %v420_v0 = vld [vmem:[#allocation8 + $0xb0] sm:$0xff] }
  0xa9   :  { %272 = vmatmul.f32.vlgmr.msra.gmra.mxu3 %v199_v1  ;;  %v403_v1 = vld [vmem:[#allocation8 + $0x28] sm:$0xff]  ;;  %462 = vmatpush.msra.mxu0 %v421_v62  ;;  %v518_v62 = vld [vmem:[%s1097_s13 + $0x10] sm:$0xff] }
  0xaa   :  { %443 = vmatpush.msrb.mxu3 %v404_v63  ;;  %536 = vmatpush.msra.mxu2 %v531_v43  ;;  %v517_v63 = vld [vmem:[%s1097_s13 + $0x8] sm:$0xff] }
  0xab   :  { %463 = vmatpush.msra.mxu0 %v420_v0  ;;  %v516_v0 = vld [vmem:[%s1097_s13] sm:$0xff] }
  0xac   :  { %444 = vmatpush.msrb.mxu3 %v403_v1  ;;  %537 = vmatpush.msra.mxu2 %v530_v44  ;;  %v655_v1 = vld [vmem:[%s1096_s12] ss:$0 sm:$0xff] }
  0xad   :  { %464 = vmatpush.msra.mxu0 %v419_v9 }
  0xae   :  { %445 = vmatpush.msrb.mxu3 %v402_v2  ;;  %538 = vmatpush.msra.mxu2 %v529_v45 }
  0xaf   :  { %465 = vmatpush.msra.mxu0 %v418_v11 }
  0xb0   :  { %446 = vmatpush.msrb.mxu3 %v401_v3  ;;  %539 = vmatpush.msra.mxu2 %v528_v46 }
  0xb1   :  { %466 = vmatpush.msra.mxu0 %v417_v13 }
  0xb2   :  { %447 = vmatpush.msrb.mxu3 %v400_v8  ;;  %540 = vmatpush.msra.mxu2 %v527_v47  ;;  %v656_v8 = vld [vmem:[%s1098_s14] ss:$0 sm:$0xff] }
  0xb3   :  { %467 = vmatpush.msra.mxu0 %v416_v14 }
  0xb4   :  { %448 = vmatpush.msrb.mxu3 %v399_v10  ;;  %541 = vmatpush.msra.mxu2 %v526_v48 }
  0xb5   :  { %468 = vmatpush.msra.mxu0 %v415_v15  ;;  %v581_v15 = vld [vmem:[%s1099_s15] sm:$0xff] }
  0xb6   :  { %449 = vmatpush.msrb.mxu3 %v398_v12  ;;  %542 = vmatpush.msra.mxu2 %v525_v49 }
  0xb7   :  { %469 = vmatpush.msra.mxu0 %v414_v16 }
  0xb8   :  { %543 = vmatpush.msra.mxu2 %v524_v50 }
  0xba   :  { %544 = vmatpush.msra.mxu2 %v523_v51 }
  0xbc   :  { %545 = vmatpush.msra.mxu2 %v522_v52 }
  0xbe   :  { %546 = vmatpush.msra.mxu2 %v521_v53 }
  0xc0   :  { %547 = vmatpush.msra.mxu2 %v520_v54 }
  0xc2   :  { %548 = vmatpush.msra.mxu2 %v519_v56 }
  0xc4   :  { %549 = vmatpush.msra.mxu2 %v518_v62 }
  0xc6   :  { %550 = vmatpush.msra.mxu2 %v517_v63 }
  0xc8   :  { %551 = vmatpush.msra.mxu2 %v516_v0 }
 0x12b   :  { %v253_v34 = vpop.f32.mrf.mxu2 }
 0x12c   :  { %v273_v35 = vpop.f32.mrf.mxu3  ;;  %v254_v36 = vadd.f32 %v652_v31, %v253_v34  ;;  %v479_v31 = vld [vmem:[#allocation10 + $0x20] sm:$0xff] }
 0x12d   :  { %506 = vmatpush.msra.mxu1 %v479_v31 }
 0x12e   :  { %v274_v37 = vadd.f32 %v273_v35, %v254_v36  ;;  %v353_v35 = vperm.slane %v350_v27, 1 }
 0x12f   :  { %507 = vmatpush.msra.mxu1 %v478_v39 }
 0x130   :  { %v276_v38 = vmax.f32 %v274_v37, 0.0 }
 0x131   :  { %508 = vmatpush.msra.mxu1 %v477_v40 }
 0x132   :  { %313 = vmatmul.f32.vlgmr.msrb.gmra.mxu0 %v276_v38 }
 0x133   :  { %509 = vmatpush.msra.mxu1 %v476_v41 }
 0x135   :  { %510 = vmatpush.msra.mxu1 %v475_v42 }
 0x1af   :  { %v314_v5 = vpop.f32.mrf.mxu0 }
 0x1b0   :  { %v315_v6 = vadd.f32 %v653_v4, %v314_v5  ;;  %v584_v5 = vld [vmem:[%s1099_s15 + $0x18] sm:$0xff] }
 0x1b1   :  { %605 = vmatpush.msra.mxu3 %v584_v5 }
 0x1b2   :  { %v317_v7 = vmax.f32 %v315_v6, 0.0  ;;  %v583_v6 = vld [vmem:[%s1099_s15 + $0x10] sm:$0xff] }
 0x1b3   :  { %606 = vmatpush.msra.mxu3 %v583_v6 }
 0x1b4   :  { %372 = vmatmul.f32.vlgmr.msrb.gmra.mxu1 %v317_v7  ;;  %392 = vmatmul.f32.vlgmr.msrb.gmra.mxu2 %v317_v7  ;;  %v582_v7 = vld [vmem:[%s1099_s15 + $0x8] sm:$0xff] }
 0x1b5   :  { %607 = vmatpush.msra.mxu3 %v582_v7 }
 0x1b7   :  { %608 = vmatpush.msra.mxu3 %v581_v15 }
 0x231   :  { %v373_v32 = vpop.f32.mrf.mxu1 }
 0x232   :  { %v374_v33 = vadd.f32 %v373_v32, %v352_v29  ;;  %v657_v29 = vld [vmem:[%s1100_s16] ss:$0 sm:$0xff] }
 0x234   :  { %v396_v34 = vmax.f32 %v374_v33, 0.0 }
 0x236   :  { %450 = vmatmul.f32.vlgmr.msrb.gmra.mxu3 %v396_v34 }
 0x237   :  { %v393_v36 = vpop.f32.mrf.mxu2 }
 0x238   :  { %v394_v37 = vadd.f32 %v393_v36, %v353_v35 }
 0x23a   :  { %v397_v38 = vmax.f32 %v394_v37, 0.0 }
 0x23c   :  { %470 = vmatmul.f32.vlgmr.msra.gmra.mxu0 %v397_v38 }
 0x2b9   :  { %v451_v57 = vpop.f32.mrf.mxu3  ;;  %v471_v59 = vpop.f32.mrf.mxu0 }
 0x2ba   :  { %v452_v58 = vadd.f32 %v654_v55, %v451_v57 }
 0x2bc   :  { %v472_v60 = vadd.f32 %v471_v59, %v452_v58 }
 0x2be   :  { %v474_v61 = vmax.f32 %v472_v60, 0.0 }
 0x2c0   :  { %511 = vmatmul.f32.vlgmr.msra.gmra.mxu1 %v474_v61 }
 0x33d   :  { %v512_v2 = vpop.f32.mrf.mxu1 }
 0x33e   :  { %v513_v3 = vadd.f32 %v655_v1, %v512_v2 }
 0x340   :  { %v515_v4 = vmax.f32 %v513_v3, 0.0 }
 0x342   :  { %552 = vmatmul.f32.vlgmr.msra.gmra.mxu2 %v515_v4 }
 0x3c5   :  { %v553_v9 = vpop.f32.mrf.mxu2 }
 0x3c6   :  { %v554_v10 = vadd.f32 %v656_v8, %v553_v9 }
 0x3c8   :  { %658 = vtanh.f32 %v554_v10  ;;  %v639_v12 = vmul.f32 -1.442695, %v554_v10 }
 0x3ca   :  { %660 = vpow2.f32 %v639_v12 }
 0x3ce   :  { %v659_v11 = vpop.eup %658 }
 0x3cf   :  { %577 = vrot.lane.b32.xlu0 %v659_v11, %s825_s22 }
 0x3d0   :  { %v661_v13 = vpop.eup %660 }
 0x3d1   :  { %v559_v14 = vadd.f32 1.0, %v661_v13 }
 0x3d3   :  { %662 = vrcp.f32 %v559_v14  ;;  %v571_v22 = vand.u32 2147483648, %v559_v14  ;;  %vm565_vm2 = vweird.f32 %v559_v14  ;;  %v569_v23 = vand.u32 2147483647, %v559_v14 }
 0x3d5   :  { %v572_v25 = vor.u32 1.1754944e-38, %v571_v22  ;;  %vm570_vm4 = vcmp.eq.f32.partialorder %v569_v23, 8.507059e+37 }
 0x3d9   :  { %v663_v16 = vpop.eup %662 }
 0x3da   :  { %v561_v17 = vmul.f32 %v663_v16, %v559_v14  ;;  %vm566_vm1 = vweird.f32 %v663_v16 }
 0x3db   :  { %vm567_vm3 = vmor %vm565_vm2, %vm566_vm1 }
 0x3dc   :  { %v562_v19 = vsub.f32 1.0, %v561_v17 }
 0x3de   :  { %v563_v20 = vmul.f32 %v663_v16, %v562_v19 }
 0x3e0   :  { %v564_v21 = vadd.f32 %v663_v16, %v563_v20 }
 0x3e2   :  { %v568_v24 = vsel %vm567_vm3, %v663_v16, %v564_v21 }
 0x3e3   :  { %v573_v26 = vsel %vm570_vm4, %v572_v25, %v568_v24 }
 0x441   :  { %v578_v27 = vpop.permute.xlu0 %577 }
 0x442   :  { %v580_v28 = vmul.f32 %v578_v27, %v573_v26 }
 0x444   :  { %640 = vmatmul.msk.f32.vlgmr.msra.gmra.mxu3 %vm589_vm5, %v580_v28 }
 0x4c7   :  { %v610_v31 = vpop.f32.mrf.mxu3 }
 0x4c8   :  { %v611_v32 = vadd.f32 %v657_v29, %v610_v31 }
 0x4ca   :  { %v614_v33 = vadd.f32 %v613_v30, %v611_v32 }
 0x4cc   :  { %615 = vst.msk [vmem:[#allocation11] sm:$0xff] %vm589_vm5, %v614_v33 }
 0x4cd   :  { %617 = vst.msk [vmem:[#allocation11] sm:$0xff] %vm616_vm6, %v611_v32 }
 0x4ce   :  { %628 = dma.vmem_to_hbm [thread:$0]  %s624_s20, 128, %s626_s8, [#allocation4]  }
 0x4cf   :  { %814 = dma.done.wait [#allocation4], 128  }
 0x4d0   :  { %815 = vsyncadd [#allocation4], 4294967168 }
 0x4d1   :  { %633 = vsyncpa [#allocation3], 1 }
 0x4d2   :  { %634 = vsyncpa [#allocation6], 1 }
 0x4d3   :  { %635 = vsyncpa [#allocation9], 1 }
 0x4d4   :  { %636 = vsyncpa [#allocation4], 1 }

</bundles_post_ra>
